<compile_context>
chip_gen: v6e
topology: v6e:2x2x1
jax: 0.10.0
libtpu: 0.0.40
codegen_flags: <defaults>
</compile_context>

<pallas_src>
import functools
import math

import jax
import jax.numpy as jnp
from jax.experimental import pallas as pl
from jax.experimental.pallas import tpu as pltpu

LN_EPS = 1e-5  # PyTorch nn.LayerNorm default


def _layer_norm(x, gamma, beta):
    """f32 LayerNorm over the last dim.  x: (S, E); gamma/beta: (1, E)."""
    mu = jnp.mean(x, axis=-1, keepdims=True)
    var = jnp.mean((x - mu) ** 2, axis=-1, keepdims=True)
    return (x - mu) * jax.lax.rsqrt(var + LN_EPS) * gamma + beta


def fused_encoder_kernel(x_ref, wqkv_ref, bqkv_ref, wo_ref, bo_ref,
                         g1_ref, be1_ref, w1_ref, b1_ref, w2_ref, b2_ref,
                         g2_ref, be2_ref, gf_ref, bf_ref,
                         o_ref, x_acc, *, nhead, has_final_norm):
    """Grid = (batch, layer).  One batch element resident in VMEM across all layers.

    x_ref / o_ref: (1, S, E).  Stacked weights (leading layer dim, bf16):
      wqkv: (1,E,3E)  wo: (1,E,E)  w1: (1,E,F)  w2: (1,F,E).
    Biases / LN params (f32): (1, 1, dim).  Final norm gamma/beta: (1, E).
    """
    layer = pl.program_id(1)
    n_layers = pl.num_programs(1)

    # Load the input once per batch element; keep it resident in VMEM across layers.
    @pl.when(layer == 0)
    def _():
        x_acc[...] = x_ref[0].astype(jnp.float32)

    S, E = x_acc.shape
    dh = E // nhead

    x = x_acc[...]                                              # (S, E) f32

    # ---------------- multi-head self-attention ----------------
    # One big QKV projection (1/sqrt(dh) already folded into the Q weights/bias).
    qkv = jnp.dot(x.astype(jnp.bfloat16), wqkv_ref[0],
                  preferred_element_type=jnp.float32) + bqkv_ref[0]     # (S, 3E) f32

    # Split heads onto a leading (batch) axis -> (nhead, S, dh); head-batched matmuls.
    q3 = jnp.stack([qkv[:, 0 * E + h * dh: 0 * E + (h + 1) * dh] for h in range(nhead)])
    k3 = jnp.stack([qkv[:, 1 * E + h * dh: 1 * E + (h + 1) * dh] for h in range(nhead)])
    v3 = jnp.stack([qkv[:, 2 * E + h * dh: 2 * E + (h + 1) * dh] for h in range(nhead)])
    q3 = q3.astype(jnp.bfloat16)
    k3 = k3.astype(jnp.bfloat16)
    v3 = v3.astype(jnp.bfloat16)

    s = jnp.einsum('hqd,hkd->hqk', q3, k3,
                   preferred_element_type=jnp.float32)          # (nhead, S, S) f32
    s = s - jnp.max(s, axis=-1, keepdims=True)                  # stable softmax (f32)
    p = jnp.exp(s)
    inv_den = pl.reciprocal(jnp.sum(p, axis=-1, keepdims=True), approx=True)
    p = p * inv_den

    ctx = jnp.einsum('hqk,hkd->hqd', p.astype(jnp.bfloat16), v3,
                     preferred_element_type=jnp.float32)        # (nhead, S, dh) f32
    attn = jnp.concatenate([ctx[h] for h in range(nhead)], axis=-1)   # (S, E) f32
    attn = jnp.dot(attn.astype(jnp.bfloat16), wo_ref[0],
                   preferred_element_type=jnp.float32) + bo_ref[0]

    # residual + norm1 (post-norm; dropout = identity in eval)
    x = _layer_norm(x + attn, g1_ref[0], be1_ref[0])

    # ---------------- feed-forward ----------------
    h1 = jnp.dot(x.astype(jnp.bfloat16), w1_ref[0],
                 preferred_element_type=jnp.float32) + b1_ref[0]
    h1 = jnp.maximum(h1, 0.0)                                   # ReLU (PyTorch default)
    ff = jnp.dot(h1.astype(jnp.bfloat16), w2_ref[0],
                 preferred_element_type=jnp.float32) + b2_ref[0]

    # residual + norm2
    x = _layer_norm(x + ff, g2_ref[0], be2_ref[0])

    # carry to next layer
    x_acc[...] = x

    # Write the output only once, after the last layer (optionally with the final norm).
    @pl.when(layer == n_layers - 1)
    def _():
        xo = x
        if has_final_norm:
            xo = _layer_norm(xo, gf_ref[...], bf_ref[...])
        o_ref[0] = xo.astype(o_ref.dtype)


def transformer_encoder_forward(src_sbe, params, nhead, has_final_norm=True):
    """src_sbe: (S, B, E) seq-first like PyTorch.  Returns (S, B, E) f32."""
    S, B, E = src_sbe.shape
    assert E % nhead == 0
    L = params["wqkv_t"].shape[0]
    F = params["w1_t"].shape[2]

    x_bse = jnp.transpose(src_sbe, (1, 0, 2))        # (B, S, E)

    kernel = functools.partial(fused_encoder_kernel, nhead=nhead,
                               has_final_norm=has_final_norm)

    xmap = lambda b, l: (b, 0, 0)                    # per-batch activation block
    wmap = lambda b, l: (l, 0, 0)                    # per-layer weight block
    cmap = lambda b, l: (0, 0)                       # constant (final norm) block

    out = pl.pallas_call(
        kernel,
        out_shape=jax.ShapeDtypeStruct((B, S, E), jnp.float32),
        grid=(B, L),
        in_specs=[
            pl.BlockSpec((1, S, E), xmap),           # x
            pl.BlockSpec((1, E, 3 * E), wmap),       # wqkv_t (bf16)
            pl.BlockSpec((1, 1, 3 * E), wmap),       # bqkv
            pl.BlockSpec((1, E, E), wmap),           # wo_t (bf16)
            pl.BlockSpec((1, 1, E), wmap),           # bo
            pl.BlockSpec((1, 1, E), wmap),           # ln1 gamma
            pl.BlockSpec((1, 1, E), wmap),           # ln1 beta
            pl.BlockSpec((1, E, F), wmap),           # w1_t (bf16)
            pl.BlockSpec((1, 1, F), wmap),           # b1
            pl.BlockSpec((1, F, E), wmap),           # w2_t (bf16)
            pl.BlockSpec((1, 1, E), wmap),           # b2
            pl.BlockSpec((1, 1, E), wmap),           # ln2 gamma
            pl.BlockSpec((1, 1, E), wmap),           # ln2 beta
            pl.BlockSpec((1, E), cmap),              # final norm gamma
            pl.BlockSpec((1, E), cmap),              # final norm beta
        ],
        out_specs=pl.BlockSpec((1, S, E), xmap),
        scratch_shapes=[pltpu.VMEM((S, E), jnp.float32)],   # x resident across layers
        compiler_params=pltpu.CompilerParams(
            dimension_semantics=("parallel", "arbitrary")),
    )(x_bse, params["wqkv_t"], params["bqkv"], params["wo_t"], params["bo"],
      params["g1"], params["be1"], params["w1_t"], params["b1"],
      params["w2_t"], params["b2"], params["g2"], params["be2"],
      params["gf"], params["bf"])

    return jnp.transpose(out, (1, 0, 2))             # back to (S, B, E)


def encoder_reference(x_bse, params, nhead, has_final_norm=True):
    """Pure-JAX reference (same bf16 matmul casts as the kernel).  x_bse: (B, S, E)."""
    B, S, E = x_bse.shape
    L = params["wqkv_t"].shape[0]
    dh = E // nhead

    def ln(v, g, b):
        mu = jnp.mean(v, axis=-1, keepdims=True)
        var = jnp.mean((v - mu) ** 2, axis=-1, keepdims=True)
        return (v - mu) * jax.lax.rsqrt(var + LN_EPS) * g + b

    x = x_bse.astype(jnp.float32)
    for l in range(L):
        qkv = jnp.dot(x.astype(jnp.bfloat16), params["wqkv_t"][l],
                      preferred_element_type=jnp.float32) + params["bqkv"][l]
        q = qkv[..., 0 * E:1 * E].reshape(B, S, nhead, dh).transpose(0, 2, 1, 3)
        k = qkv[..., 1 * E:2 * E].reshape(B, S, nhead, dh).transpose(0, 2, 1, 3)
        v = qkv[..., 2 * E:3 * E].reshape(B, S, nhead, dh).transpose(0, 2, 1, 3)
        s = jnp.einsum('bhqd,bhkd->bhqk', q.astype(jnp.bfloat16), k.astype(jnp.bfloat16),
                       preferred_element_type=jnp.float32)
        p = jax.nn.softmax(s, axis=-1)
        ctx = jnp.einsum('bhqk,bhkd->bhqd', p.astype(jnp.bfloat16), v.astype(jnp.bfloat16),
                         preferred_element_type=jnp.float32)
        ctx = ctx.transpose(0, 2, 1, 3).reshape(B, S, E)
        attn = jnp.dot(ctx.astype(jnp.bfloat16), params["wo_t"][l],
                       preferred_element_type=jnp.float32) + params["bo"][l]
        x = ln(x + attn, params["g1"][l], params["be1"][l])
        h1 = jnp.maximum(jnp.dot(x.astype(jnp.bfloat16), params["w1_t"][l],
                                 preferred_element_type=jnp.float32) + params["b1"][l], 0.0)
        ff = jnp.dot(h1.astype(jnp.bfloat16), params["w2_t"][l],
                     preferred_element_type=jnp.float32) + params["b2"][l]
        x = ln(x + ff, params["g2"][l], params["be2"][l])
    if has_final_norm:
        x = ln(x, params["gf"], params["bf"])
    return x


def init_params(key, num_layers, d_model, dim_ff, nhead):
    """Deterministic params, PyTorch-style layouts pre-transposed for x @ W.

    The 1/sqrt(d_head) attention scale is folded into the Q projection here.
    Matmul weights are stored in bf16; biases / LayerNorm params stay f32.
    """
    dh = d_model // nhead
    qscale = 1.0 / math.sqrt(dh)
    per_layer = []
    for k in jax.random.split(key, num_layers):
        ks = jax.random.split(k, 6)
        scale = 0.05
        wqkv = scale * jax.random.normal(ks[0], (3 * d_model, d_model), jnp.float32)
        wo = scale * jax.random.normal(ks[1], (d_model, d_model), jnp.float32)
        w1 = scale * jax.random.normal(ks[2], (dim_ff, d_model), jnp.float32)
        w2 = scale * jax.random.normal(ks[3], (d_model, dim_ff), jnp.float32)
        bqkv = 0.01 * jax.random.normal(ks[4], (3 * d_model,), jnp.float32)
        b1 = 0.01 * jax.random.normal(ks[5], (dim_ff,), jnp.float32)

        wqkv_t = wqkv.T                                     # (E, 3E)
        wqkv_t = wqkv_t.at[:, :d_model].multiply(qscale)    # fold 1/sqrt(dh) into Q
        bqkv = bqkv.at[:d_model].multiply(qscale)

        per_layer.append(dict(
            wqkv_t=wqkv_t, bqkv=bqkv,
            wo_t=wo.T, bo=jnp.zeros((d_model,), jnp.float32),
            g1=jnp.ones((d_model,), jnp.float32), be1=jnp.zeros((d_model,), jnp.float32),
            w1_t=w1.T, b1=b1,
            w2_t=w2.T, b2=jnp.zeros((d_model,), jnp.float32),
            g2=jnp.ones((d_model,), jnp.float32), be2=jnp.zeros((d_model,), jnp.float32),
        ))

    stack = lambda name: jnp.stack([p[name] for p in per_layer])
    params = {
        # matmul weights: (L, ., .) bf16
        "wqkv_t": stack("wqkv_t").astype(jnp.bfloat16),     # (L, E, 3E)
        "wo_t": stack("wo_t").astype(jnp.bfloat16),         # (L, E, E)
        "w1_t": stack("w1_t").astype(jnp.bfloat16),         # (L, E, F)
        "w2_t": stack("w2_t").astype(jnp.bfloat16),         # (L, F, E)
    }
    # biases / LN params: (L, 1, dim) f32
    for name in ("bqkv", "bo", "g1", "be1", "b1", "b2", "g2", "be2"):
        params[name] = stack(name)[:, None, :]
    # final LayerNorm (nn.LayerNorm default init)
    params["gf"] = jnp.ones((1, d_model), jnp.float32)
    params["bf"] = jnp.zeros((1, d_model), jnp.float32)
    return params


if __name__ == "__main__":
    S, B, E = 8, 2, 32          # seq, batch, d_model
    NHEAD = 4
    DIM_FF = 64
    NUM_LAYERS = 2

    root = jax.random.PRNGKey(0)
    k_src, k_par = jax.random.split(root)

    src = jax.random.normal(k_src, (S, B, E), jnp.float32)
    params = init_params(k_par, NUM_LAYERS, E, DIM_FF, NHEAD)

    out = transformer_encoder_forward(src, params, NHEAD, has_final_norm=True)
    out = jax.block_until_ready(out)
    assert out.shape == (S, B, E)
    assert bool(jnp.all(jnp.isfinite(out)))

    # Correctness vs pure-JAX reference (same bf16 casts; loose tol covers approx recip).
    ref_bse = encoder_reference(jnp.transpose(src, (1, 0, 2)), params, NHEAD, True)
    out_bse = jnp.transpose(out, (1, 0, 2))
    assert bool(jnp.allclose(out_bse, ref_bse, rtol=2e-2, atol=2e-2))

    print("KERNEL_OK")
</pallas_src>

<mosaic_0001>
module attributes {stable_mosaic.version = 11 : i64} {
  func.func @fused_encoder_kernel(%arg0: i32, %arg1: i32, %arg2: memref<1x8x32xf32, #tpu.memory_space<vmem>>, %arg3: memref<1x32x96xbf16, #tpu.memory_space<vmem>>, %arg4: memref<1x1x96xf32, #tpu.memory_space<vmem>>, %arg5: memref<1x32x32xbf16, #tpu.memory_space<vmem>>, %arg6: memref<1x1x32xf32, #tpu.memory_space<vmem>>, %arg7: memref<1x1x32xf32, #tpu.memory_space<vmem>>, %arg8: memref<1x1x32xf32, #tpu.memory_space<vmem>>, %arg9: memref<1x32x64xbf16, #tpu.memory_space<vmem>>, %arg10: memref<1x1x64xf32, #tpu.memory_space<vmem>>, %arg11: memref<1x64x32xbf16, #tpu.memory_space<vmem>>, %arg12: memref<1x1x32xf32, #tpu.memory_space<vmem>>, %arg13: memref<1x1x32xf32, #tpu.memory_space<vmem>>, %arg14: memref<1x1x32xf32, #tpu.memory_space<vmem>>, %arg15: memref<1x32xf32, #tpu.memory_space<vmem>>, %arg16: memref<1x32xf32, #tpu.memory_space<vmem>>, %arg17: memref<1x8x32xf32, #tpu.memory_space<vmem>>, %arg18: memref<8x32xf32, #tpu.memory_space<vmem>>) attributes {dimension_semantics = [#tpu.dimension_semantics<parallel>, #tpu.dimension_semantics<arbitrary>], iteration_bounds = array<i64: 2, 2>, scalar_prefetch = 0 : i64, scratch_operands = 1 : i64, tpu.core_type = #tpu.core_type<tc>, window_params = [{transform_indices = @transform_0, window_bounds = array<i64: 1, 8, 32>}, {transform_indices = @transform_1, window_bounds = array<i64: 1, 32, 96>}, {transform_indices = @transform_2, window_bounds = array<i64: 1, 1, 96>}, {transform_indices = @transform_3, window_bounds = array<i64: 1, 32, 32>}, {transform_indices = @transform_4, window_bounds = array<i64: 1, 1, 32>}, {transform_indices = @transform_5, window_bounds = array<i64: 1, 1, 32>}, {transform_indices = @transform_6, window_bounds = array<i64: 1, 1, 32>}, {transform_indices = @transform_7, window_bounds = array<i64: 1, 32, 64>}, {transform_indices = @transform_8, window_bounds = array<i64: 1, 1, 64>}, {transform_indices = @transform_9, window_bounds = array<i64: 1, 64, 32>}, {transform_indices = @transform_10, window_bounds = array<i64: 1, 1, 32>}, {transform_indices = @transform_11, window_bounds = array<i64: 1, 1, 32>}, {transform_indices = @transform_12, window_bounds = array<i64: 1, 1, 32>}, {pipeline_mode = #tpu.pipeline_mode<synchronous>, transform_indices = @transform_13, window_bounds = array<i64: 1, 32>}, {pipeline_mode = #tpu.pipeline_mode<synchronous>, transform_indices = @transform_14, window_bounds = array<i64: 1, 32>}, {transform_indices = @transform_15, window_bounds = array<i64: 1, 8, 32>}]} {
    %c0_i32 = arith.constant 0 : i32
    %0 = arith.cmpi eq, %arg1, %c0_i32 : i32
    %1 = arith.extui %0 : i1 to i32
    %c0_i32_0 = arith.constant 0 : i32
    %2 = arith.cmpi ne, %1, %c0_i32_0 : i32
    scf.if %2 {
      %c0_59 = arith.constant 0 : index
      %c0_60 = arith.constant 0 : index
      %c0_61 = arith.constant 0 : index
      %148 = vector.load %arg2[%c0_59, %c0_60, %c0_61] : memref<1x8x32xf32, #tpu.memory_space<vmem>>, vector<1x8x32xf32>
      %149 = vector.shape_cast %148 : vector<1x8x32xf32> to vector<8x32xf32>
      %c0_62 = arith.constant 0 : index
      %c0_63 = arith.constant 0 : index
      %150 = vector.load %arg18[%c0_62, %c0_63] : memref<8x32xf32, #tpu.memory_space<vmem>>, vector<8x32xf32>
      tpu.vector_store %arg18[%c0_62, %c0_63], %149 {strides = array<i32>} : memref<8x32xf32, #tpu.memory_space<vmem>>, vector<8x32xf32>,
    } else {
    }
    %c0 = arith.constant 0 : index
    %c0_1 = arith.constant 0 : index
    %3 = vector.load %arg18[%c0, %c0_1] : memref<8x32xf32, #tpu.memory_space<vmem>>, vector<8x32xf32>
    %4 = arith.truncf %3 : vector<8x32xf32> to vector<8x32xbf16>
    %c0_2 = arith.constant 0 : index
    %c0_3 = arith.constant 0 : index
    %c0_4 = arith.constant 0 : index
    %5 = vector.load %arg3[%c0_2, %c0_3, %c0_4] : memref<1x32x96xbf16, #tpu.memory_space<vmem>>, vector<1x32x96xbf16>
    %6 = vector.shape_cast %5 : vector<1x32x96xbf16> to vector<32x96xbf16>
    %cst = arith.constant dense<0.000000e+00> : vector<8x96xf32>
    %7 = tpu.matmul %4, %6, %cst {dimension_numbers = #tpu.dot_dimension_numbers<[1], [0], [0], [1], [0, 0, 1, 1], [], []>} : vector<8x32xbf16>, vector<32x96xbf16>, vector<8x96xf32> -> vector<8x96xf32>
    %c0_5 = arith.constant 0 : index
    %c0_6 = arith.constant 0 : index
    %c0_7 = arith.constant 0 : index
    %8 = vector.load %arg4[%c0_5, %c0_6, %c0_7] : memref<1x1x96xf32, #tpu.memory_space<vmem>>, vector<1x1x96xf32>
    %9 = vector.shape_cast %8 : vector<1x1x96xf32> to vector<1x96xf32>
    %10 = vector.broadcast %9 : vector<1x96xf32> to vector<8x96xf32>
    %11 = arith.addf %7, %10 : vector<8x96xf32>
    %12 = vector.extract_strided_slice %11 {offsets = [0, 0], sizes = [8, 8], strides = [1, 1]} : vector<8x96xf32> to vector<8x8xf32>
    %13 = vector.extract_strided_slice %11 {offsets = [0, 8], sizes = [8, 8], strides = [1, 1]} : vector<8x96xf32> to vector<8x8xf32>
    %14 = vector.extract_strided_slice %11 {offsets = [0, 16], sizes = [8, 8], strides = [1, 1]} : vector<8x96xf32> to vector<8x8xf32>
    %15 = vector.extract_strided_slice %11 {offsets = [0, 24], sizes = [8, 8], strides = [1, 1]} : vector<8x96xf32> to vector<8x8xf32>
    %16 = vector.shape_cast %12 : vector<8x8xf32> to vector<1x8x8xf32>
    %17 = vector.shape_cast %13 : vector<8x8xf32> to vector<1x8x8xf32>
    %18 = vector.shape_cast %14 : vector<8x8xf32> to vector<1x8x8xf32>
    %19 = vector.shape_cast %15 : vector<8x8xf32> to vector<1x8x8xf32>
    %20 = tpu.concatenate %16, %17, %18, %19 in 0 : vector<1x8x8xf32>, vector<1x8x8xf32>, vector<1x8x8xf32>, vector<1x8x8xf32> -> vector<4x8x8xf32>
    %21 = vector.extract_strided_slice %11 {offsets = [0, 32], sizes = [8, 8], strides = [1, 1]} : vector<8x96xf32> to vector<8x8xf32>
    %22 = vector.extract_strided_slice %11 {offsets = [0, 40], sizes = [8, 8], strides = [1, 1]} : vector<8x96xf32> to vector<8x8xf32>
    %23 = vector.extract_strided_slice %11 {offsets = [0, 48], sizes = [8, 8], strides = [1, 1]} : vector<8x96xf32> to vector<8x8xf32>
    %24 = vector.extract_strided_slice %11 {offsets = [0, 56], sizes = [8, 8], strides = [1, 1]} : vector<8x96xf32> to vector<8x8xf32>
    %25 = vector.shape_cast %21 : vector<8x8xf32> to vector<1x8x8xf32>
    %26 = vector.shape_cast %22 : vector<8x8xf32> to vector<1x8x8xf32>
    %27 = vector.shape_cast %23 : vector<8x8xf32> to vector<1x8x8xf32>
    %28 = vector.shape_cast %24 : vector<8x8xf32> to vector<1x8x8xf32>
    %29 = tpu.concatenate %25, %26, %27, %28 in 0 : vector<1x8x8xf32>, vector<1x8x8xf32>, vector<1x8x8xf32>, vector<1x8x8xf32> -> vector<4x8x8xf32>
    %30 = vector.extract_strided_slice %11 {offsets = [0, 64], sizes = [8, 8], strides = [1, 1]} : vector<8x96xf32> to vector<8x8xf32>
    %31 = vector.extract_strided_slice %11 {offsets = [0, 72], sizes = [8, 8], strides = [1, 1]} : vector<8x96xf32> to vector<8x8xf32>
    %32 = vector.extract_strided_slice %11 {offsets = [0, 80], sizes = [8, 8], strides = [1, 1]} : vector<8x96xf32> to vector<8x8xf32>
    %33 = vector.extract_strided_slice %11 {offsets = [0, 88], sizes = [8, 8], strides = [1, 1]} : vector<8x96xf32> to vector<8x8xf32>
    %34 = vector.shape_cast %30 : vector<8x8xf32> to vector<1x8x8xf32>
    %35 = vector.shape_cast %31 : vector<8x8xf32> to vector<1x8x8xf32>
    %36 = vector.shape_cast %32 : vector<8x8xf32> to vector<1x8x8xf32>
    %37 = vector.shape_cast %33 : vector<8x8xf32> to vector<1x8x8xf32>
    %38 = tpu.concatenate %34, %35, %36, %37 in 0 : vector<1x8x8xf32>, vector<1x8x8xf32>, vector<1x8x8xf32>, vector<1x8x8xf32> -> vector<4x8x8xf32>
    %39 = arith.truncf %20 : vector<4x8x8xf32> to vector<4x8x8xbf16>
    %40 = arith.truncf %29 : vector<4x8x8xf32> to vector<4x8x8xbf16>
    %41 = arith.truncf %38 : vector<4x8x8xf32> to vector<4x8x8xbf16>
    "tpu.trace_start"() <{level = 10 : i32, message = "hqd,hkd->hqk"}> : () -> ()
    %cst_8 = arith.constant dense<0.000000e+00> : vector<4x8x8xf32>
    %42 = tpu.matmul %39, %40, %cst_8 {dimension_numbers = #tpu.dot_dimension_numbers<[2], [2], [1], [1], [0, 0, 0, 1, 1, 1], [0], [0]>} : vector<4x8x8xbf16>, vector<4x8x8xbf16>, vector<4x8x8xf32> -> vector<4x8x8xf32>
    "tpu.trace_stop"() : () -> ()
    %cst_9 = arith.constant dense<0xFF800000> : vector<4x8xf32>
    %43 = vector.multi_reduction <maximumf>, %42, %cst_9 [2] : vector<4x8x8xf32> to vector<4x8xf32>
    %44 = vector.shape_cast %43 : vector<4x8xf32> to vector<4x8x1xf32>
    %45 = vector.broadcast %44 : vector<4x8x1xf32> to vector<4x8x8xf32>
    %46 = arith.subf %42, %45 : vector<4x8x8xf32>
    %47 = math.exp %46 : vector<4x8x8xf32>
    %cst_10 = arith.constant dense<0.000000e+00> : vector<4x8xf32>
    %48 = vector.multi_reduction <add>, %47, %cst_10 [2] : vector<4x8x8xf32> to vector<4x8xf32>
    %49 = vector.shape_cast %48 : vector<4x8xf32> to vector<4x8x1xf32>
    %50 = tpu.reciprocal %49 {approx = true} : vector<4x8x1xf32> -> vector<4x8x1xf32>
    %51 = vector.broadcast %50 : vector<4x8x1xf32> to vector<4x8x8xf32>
    %52 = arith.mulf %47, %51 : vector<4x8x8xf32>
    %53 = arith.truncf %52 : vector<4x8x8xf32> to vector<4x8x8xbf16>
    "tpu.trace_start"() <{level = 10 : i32, message = "hqk,hkd->hqd"}> : () -> ()
    %cst_11 = arith.constant dense<0.000000e+00> : vector<4x8x8xf32>
    %54 = tpu.matmul %53, %41, %cst_11 {dimension_numbers = #tpu.dot_dimension_numbers<[2], [1], [1], [2], [0, 0, 0, 1, 1, 2], [0], [0]>} : vector<4x8x8xbf16>, vector<4x8x8xbf16>, vector<4x8x8xf32> -> vector<4x8x8xf32>
    "tpu.trace_stop"() : () -> ()
    %55 = vector.extract_strided_slice %54 {offsets = [0, 0, 0], sizes = [1, 8, 8], strides = [1, 1, 1]} : vector<4x8x8xf32> to vector<1x8x8xf32>
    %56 = vector.shape_cast %55 : vector<1x8x8xf32> to vector<8x8xf32>
    %57 = vector.extract_strided_slice %54 {offsets = [1, 0, 0], sizes = [1, 8, 8], strides = [1, 1, 1]} : vector<4x8x8xf32> to vector<1x8x8xf32>
    %58 = vector.shape_cast %57 : vector<1x8x8xf32> to vector<8x8xf32>
    %59 = vector.extract_strided_slice %54 {offsets = [2, 0, 0], sizes = [1, 8, 8], strides = [1, 1, 1]} : vector<4x8x8xf32> to vector<1x8x8xf32>
    %60 = vector.shape_cast %59 : vector<1x8x8xf32> to vector<8x8xf32>
    %61 = vector.extract_strided_slice %54 {offsets = [3, 0, 0], sizes = [1, 8, 8], strides = [1, 1, 1]} : vector<4x8x8xf32> to vector<1x8x8xf32>
    %62 = vector.shape_cast %61 : vector<1x8x8xf32> to vector<8x8xf32>
    %63 = tpu.concatenate %56, %58, %60, %62 in 1 : vector<8x8xf32>, vector<8x8xf32>, vector<8x8xf32>, vector<8x8xf32> -> vector<8x32xf32>
    %64 = arith.truncf %63 : vector<8x32xf32> to vector<8x32xbf16>
    %c0_12 = arith.constant 0 : index
    %c0_13 = arith.constant 0 : index
    %c0_14 = arith.constant 0 : index
    %65 = vector.load %arg5[%c0_12, %c0_13, %c0_14] : memref<1x32x32xbf16, #tpu.memory_space<vmem>>, vector<1x32x32xbf16>
    %66 = vector.shape_cast %65 : vector<1x32x32xbf16> to vector<32x32xbf16>
    %cst_15 = arith.constant dense<0.000000e+00> : vector<8x32xf32>
    %67 = tpu.matmul %64, %66, %cst_15 {dimension_numbers = #tpu.dot_dimension_numbers<[1], [0], [0], [1], [0, 0, 1, 1], [], []>} : vector<8x32xbf16>, vector<32x32xbf16>, vector<8x32xf32> -> vector<8x32xf32>
    %c0_16 = arith.constant 0 : index
    %c0_17 = arith.constant 0 : index
    %c0_18 = arith.constant 0 : index
    %68 = vector.load %arg6[%c0_16, %c0_17, %c0_18] : memref<1x1x32xf32, #tpu.memory_space<vmem>>, vector<1x1x32xf32>
    %69 = vector.shape_cast %68 : vector<1x1x32xf32> to vector<1x32xf32>
    %70 = vector.broadcast %69 : vector<1x32xf32> to vector<8x32xf32>
    %71 = arith.addf %67, %70 : vector<8x32xf32>
    %72 = arith.addf %3, %71 : vector<8x32xf32>
    %c0_19 = arith.constant 0 : index
    %c0_20 = arith.constant 0 : index
    %c0_21 = arith.constant 0 : index
    %73 = vector.load %arg7[%c0_19, %c0_20, %c0_21] : memref<1x1x32xf32, #tpu.memory_space<vmem>>, vector<1x1x32xf32>
    %74 = vector.shape_cast %73 : vector<1x1x32xf32> to vector<1x32xf32>
    %c0_22 = arith.constant 0 : index
    %c0_23 = arith.constant 0 : index
    %c0_24 = arith.constant 0 : index
    %75 = vector.load %arg8[%c0_22, %c0_23, %c0_24] : memref<1x1x32xf32, #tpu.memory_space<vmem>>, vector<1x1x32xf32>
    %76 = vector.shape_cast %75 : vector<1x1x32xf32> to vector<1x32xf32>
    %cst_25 = arith.constant dense<0.000000e+00> : vector<8xf32>
    %77 = vector.multi_reduction <add>, %72, %cst_25 [1] : vector<8x32xf32> to vector<8xf32>
    %78 = vector.shape_cast %77 : vector<8xf32> to vector<8x1xf32>
    %cst_26 = arith.constant 3.200000e+01 : f32
    %79 = vector.broadcast %cst_26 : f32 to vector<8x1xf32>
    %80 = arith.divf %78, %79 : vector<8x1xf32>
    %81 = vector.broadcast %80 : vector<8x1xf32> to vector<8x32xf32>
    %82 = arith.subf %72, %81 : vector<8x32xf32>
    %83 = arith.mulf %82, %82 : vector<8x32xf32>
    %cst_27 = arith.constant dense<0.000000e+00> : vector<8xf32>
    %84 = vector.multi_reduction <add>, %83, %cst_27 [1] : vector<8x32xf32> to vector<8xf32>
    %85 = vector.shape_cast %84 : vector<8xf32> to vector<8x1xf32>
    %cst_28 = arith.constant 3.200000e+01 : f32
    %86 = vector.broadcast %cst_28 : f32 to vector<8x1xf32>
    %87 = arith.divf %85, %86 : vector<8x1xf32>
    %88 = vector.broadcast %80 : vector<8x1xf32> to vector<8x32xf32>
    %89 = arith.subf %72, %88 : vector<8x32xf32>
    %cst_29 = arith.constant 9.99999974E-6 : f32
    %90 = vector.broadcast %cst_29 : f32 to vector<8x1xf32>
    %91 = arith.addf %87, %90 : vector<8x1xf32>
    %92 = math.rsqrt %91 : vector<8x1xf32>
    %93 = vector.broadcast %92 : vector<8x1xf32> to vector<8x32xf32>
    %94 = arith.mulf %89, %93 : vector<8x32xf32>
    %95 = vector.broadcast %74 : vector<1x32xf32> to vector<8x32xf32>
    %96 = arith.mulf %94, %95 : vector<8x32xf32>
    %97 = vector.broadcast %76 : vector<1x32xf32> to vector<8x32xf32>
    %98 = arith.addf %96, %97 : vector<8x32xf32>
    %99 = arith.truncf %98 : vector<8x32xf32> to vector<8x32xbf16>
    %c0_30 = arith.constant 0 : index
    %c0_31 = arith.constant 0 : index
    %c0_32 = arith.constant 0 : index
    %100 = vector.load %arg9[%c0_30, %c0_31, %c0_32] : memref<1x32x64xbf16, #tpu.memory_space<vmem>>, vector<1x32x64xbf16>
    %101 = vector.shape_cast %100 : vector<1x32x64xbf16> to vector<32x64xbf16>
    %cst_33 = arith.constant dense<0.000000e+00> : vector<8x64xf32>
    %102 = tpu.matmul %99, %101, %cst_33 {dimension_numbers = #tpu.dot_dimension_numbers<[1], [0], [0], [1], [0, 0, 1, 1], [], []>} : vector<8x32xbf16>, vector<32x64xbf16>, vector<8x64xf32> -> vector<8x64xf32>
    %c0_34 = arith.constant 0 : index
    %c0_35 = arith.constant 0 : index
    %c0_36 = arith.constant 0 : index
    %103 = vector.load %arg10[%c0_34, %c0_35, %c0_36] : memref<1x1x64xf32, #tpu.memory_space<vmem>>, vector<1x1x64xf32>
    %104 = vector.shape_cast %103 : vector<1x1x64xf32> to vector<1x64xf32>
    %105 = vector.broadcast %104 : vector<1x64xf32> to vector<8x64xf32>
    %106 = arith.addf %102, %105 : vector<8x64xf32>
    %cst_37 = arith.constant 0.000000e+00 : f32
    %107 = vector.broadcast %cst_37 : f32 to vector<8x64xf32>
    %108 = arith.maximumf %106, %107 : vector<8x64xf32>
    %109 = arith.truncf %108 : vector<8x64xf32> to vector<8x64xbf16>
    %c0_38 = arith.constant 0 : index
    %c0_39 = arith.constant 0 : index
    %c0_40 = arith.constant 0 : index
    %110 = vector.load %arg11[%c0_38, %c0_39, %c0_40] : memref<1x64x32xbf16, #tpu.memory_space<vmem>>, vector<1x64x32xbf16>
    %111 = vector.shape_cast %110 : vector<1x64x32xbf16> to vector<64x32xbf16>
    %cst_41 = arith.constant dense<0.000000e+00> : vector<8x32xf32>
    %112 = tpu.matmul %109, %111, %cst_41 {dimension_numbers = #tpu.dot_dimension_numbers<[1], [0], [0], [1], [0, 0, 1, 1], [], []>} : vector<8x64xbf16>, vector<64x32xbf16>, vector<8x32xf32> -> vector<8x32xf32>
    %c0_42 = arith.constant 0 : index
    %c0_43 = arith.constant 0 : index
    %c0_44 = arith.constant 0 : index
    %113 = vector.load %arg12[%c0_42, %c0_43, %c0_44] : memref<1x1x32xf32, #tpu.memory_space<vmem>>, vector<1x1x32xf32>
    %114 = vector.shape_cast %113 : vector<1x1x32xf32> to vector<1x32xf32>
    %115 = vector.broadcast %114 : vector<1x32xf32> to vector<8x32xf32>
    %116 = arith.addf %112, %115 : vector<8x32xf32>
    %117 = arith.addf %98, %116 : vector<8x32xf32>
    %c0_45 = arith.constant 0 : index
    %c0_46 = arith.constant 0 : index
    %c0_47 = arith.constant 0 : index
    %118 = vector.load %arg13[%c0_45, %c0_46, %c0_47] : memref<1x1x32xf32, #tpu.memory_space<vmem>>, vector<1x1x32xf32>
    %119 = vector.shape_cast %118 : vector<1x1x32xf32> to vector<1x32xf32>
    %c0_48 = arith.constant 0 : index
    %c0_49 = arith.constant 0 : index
    %c0_50 = arith.constant 0 : index
    %120 = vector.load %arg14[%c0_48, %c0_49, %c0_50] : memref<1x1x32xf32, #tpu.memory_space<vmem>>, vector<1x1x32xf32>
    %121 = vector.shape_cast %120 : vector<1x1x32xf32> to vector<1x32xf32>
    %cst_51 = arith.constant dense<0.000000e+00> : vector<8xf32>
    %122 = vector.multi_reduction <add>, %117, %cst_51 [1] : vector<8x32xf32> to vector<8xf32>
    %123 = vector.shape_cast %122 : vector<8xf32> to vector<8x1xf32>
    %cst_52 = arith.constant 3.200000e+01 : f32
    %124 = vector.broadcast %cst_52 : f32 to vector<8x1xf32>
    %125 = arith.divf %123, %124 : vector<8x1xf32>
    %126 = vector.broadcast %125 : vector<8x1xf32> to vector<8x32xf32>
    %127 = arith.subf %117, %126 : vector<8x32xf32>
    %128 = arith.mulf %127, %127 : vector<8x32xf32>
    %cst_53 = arith.constant dense<0.000000e+00> : vector<8xf32>
    %129 = vector.multi_reduction <add>, %128, %cst_53 [1] : vector<8x32xf32> to vector<8xf32>
    %130 = vector.shape_cast %129 : vector<8xf32> to vector<8x1xf32>
    %cst_54 = arith.constant 3.200000e+01 : f32
    %131 = vector.broadcast %cst_54 : f32 to vector<8x1xf32>
    %132 = arith.divf %130, %131 : vector<8x1xf32>
    %133 = vector.broadcast %125 : vector<8x1xf32> to vector<8x32xf32>
    %134 = arith.subf %117, %133 : vector<8x32xf32>
    %cst_55 = arith.constant 9.99999974E-6 : f32
    %135 = vector.broadcast %cst_55 : f32 to vector<8x1xf32>
    %136 = arith.addf %132, %135 : vector<8x1xf32>
    %137 = math.rsqrt %136 : vector<8x1xf32>
    %138 = vector.broadcast %137 : vector<8x1xf32> to vector<8x32xf32>
    %139 = arith.mulf %134, %138 : vector<8x32xf32>
    %140 = vector.broadcast %119 : vector<1x32xf32> to vector<8x32xf32>
    %141 = arith.mulf %139, %140 : vector<8x32xf32>
    %142 = vector.broadcast %121 : vector<1x32xf32> to vector<8x32xf32>
    %143 = arith.addf %141, %142 : vector<8x32xf32>
    %c0_56 = arith.constant 0 : index
    %c0_57 = arith.constant 0 : index
    %144 = vector.load %arg18[%c0_56, %c0_57] : memref<8x32xf32, #tpu.memory_space<vmem>>, vector<8x32xf32>
    tpu.vector_store %arg18[%c0_56, %c0_57], %143 {strides = array<i32>} : memref<8x32xf32, #tpu.memory_space<vmem>>, vector<8x32xf32>,
    %c1_i32 = arith.constant 1 : i32
    %145 = arith.cmpi eq, %arg1, %c1_i32 : i32
    %146 = arith.extui %145 : i1 to i32
    %c0_i32_58 = arith.constant 0 : i32
    %147 = arith.cmpi ne, %146, %c0_i32_58 : i32
    scf.if %147 {
      %c0_59 = arith.constant 0 : index
      %c0_60 = arith.constant 0 : index
      %148 = vector.load %arg15[%c0_59, %c0_60] : memref<1x32xf32, #tpu.memory_space<vmem>>, vector<1x32xf32>
      %c0_61 = arith.constant 0 : index
      %c0_62 = arith.constant 0 : index
      %149 = vector.load %arg16[%c0_61, %c0_62] : memref<1x32xf32, #tpu.memory_space<vmem>>, vector<1x32xf32>
      %cst_63 = arith.constant dense<0.000000e+00> : vector<8xf32>
      %150 = vector.multi_reduction <add>, %143, %cst_63 [1] : vector<8x32xf32> to vector<8xf32>
      %151 = vector.shape_cast %150 : vector<8xf32> to vector<8x1xf32>
      %cst_64 = arith.constant 3.200000e+01 : f32
      %152 = vector.broadcast %cst_64 : f32 to vector<8x1xf32>
      %153 = arith.divf %151, %152 : vector<8x1xf32>
      %154 = vector.broadcast %153 : vector<8x1xf32> to vector<8x32xf32>
      %155 = arith.subf %143, %154 : vector<8x32xf32>
      %156 = arith.mulf %155, %155 : vector<8x32xf32>
      %cst_65 = arith.constant dense<0.000000e+00> : vector<8xf32>
      %157 = vector.multi_reduction <add>, %156, %cst_65 [1] : vector<8x32xf32> to vector<8xf32>
      %158 = vector.shape_cast %157 : vector<8xf32> to vector<8x1xf32>
      %cst_66 = arith.constant 3.200000e+01 : f32
      %159 = vector.broadcast %cst_66 : f32 to vector<8x1xf32>
      %160 = arith.divf %158, %159 : vector<8x1xf32>
      %161 = vector.broadcast %153 : vector<8x1xf32> to vector<8x32xf32>
      %162 = arith.subf %143, %161 : vector<8x32xf32>
      %cst_67 = arith.constant 9.99999974E-6 : f32
      %163 = vector.broadcast %cst_67 : f32 to vector<8x1xf32>
      %164 = arith.addf %160, %163 : vector<8x1xf32>
      %165 = math.rsqrt %164 : vector<8x1xf32>
      %166 = vector.broadcast %165 : vector<8x1xf32> to vector<8x32xf32>
      %167 = arith.mulf %162, %166 : vector<8x32xf32>
      %168 = vector.broadcast %148 : vector<1x32xf32> to vector<8x32xf32>
      %169 = arith.mulf %167, %168 : vector<8x32xf32>
      %170 = vector.broadcast %149 : vector<1x32xf32> to vector<8x32xf32>
      %171 = arith.addf %169, %170 : vector<8x32xf32>
      %c0_68 = arith.constant 0 : index
      %c0_69 = arith.constant 0 : index
      %c0_70 = arith.constant 0 : index
      %172 = vector.load %arg17[%c0_68, %c0_69, %c0_70] : memref<1x8x32xf32, #tpu.memory_space<vmem>>, vector<1x8x32xf32>
      %173 = vector.shape_cast %172 : vector<1x8x32xf32> to vector<8x32xf32>
      %174 = vector.shape_cast %171 : vector<8x32xf32> to vector<1x8x32xf32>
      tpu.vector_store %arg17[%c0_68, %c0_69, %c0_70], %174 {strides = array<i32>} : memref<1x8x32xf32, #tpu.memory_space<vmem>>, vector<1x8x32xf32>,
    } else {
    }
    return
  }
  func.func @transform_0(%arg0: i32, %arg1: i32) -> (i32, i32, i32) {
    %c0_i32 = arith.constant 0 : i32
    %c0_i32_0 = arith.constant 0 : i32
    %c0_i32_1 = arith.constant 0 : i32
    return %arg0, %c0_i32, %c0_i32_0 : i32, i32, i32
  }
  func.func @transform_1(%arg0: i32, %arg1: i32) -> (i32, i32, i32) {
    %c0_i32 = arith.constant 0 : i32
    %c0_i32_0 = arith.constant 0 : i32
    %c0_i32_1 = arith.constant 0 : i32
    return %arg1, %c0_i32, %c0_i32_0 : i32, i32, i32
  }
  func.func @transform_2(%arg0: i32, %arg1: i32) -> (i32, i32, i32) {
    %c0_i32 = arith.constant 0 : i32
    %c0_i32_0 = arith.constant 0 : i32
    %c0_i32_1 = arith.constant 0 : i32
    return %arg1, %c0_i32, %c0_i32_0 : i32, i32, i32
  }
  func.func @transform_3(%arg0: i32, %arg1: i32) -> (i32, i32, i32) {
    %c0_i32 = arith.constant 0 : i32
    %c0_i32_0 = arith.constant 0 : i32
    %c0_i32_1 = arith.constant 0 : i32
    return %arg1, %c0_i32, %c0_i32_0 : i32, i32, i32
  }
  func.func @transform_4(%arg0: i32, %arg1: i32) -> (i32, i32, i32) {
    %c0_i32 = arith.constant 0 : i32
    %c0_i32_0 = arith.constant 0 : i32
    %c0_i32_1 = arith.constant 0 : i32
    return %arg1, %c0_i32, %c0_i32_0 : i32, i32, i32
  }
  func.func @transform_5(%arg0: i32, %arg1: i32) -> (i32, i32, i32) {
    %c0_i32 = arith.constant 0 : i32
    %c0_i32_0 = arith.constant 0 : i32
    %c0_i32_1 = arith.constant 0 : i32
    return %arg1, %c0_i32, %c0_i32_0 : i32, i32, i32
  }
  func.func @transform_6(%arg0: i32, %arg1: i32) -> (i32, i32, i32) {
    %c0_i32 = arith.constant 0 : i32
    %c0_i32_0 = arith.constant 0 : i32
    %c0_i32_1 = arith.constant 0 : i32
    return %arg1, %c0_i32, %c0_i32_0 : i32, i32, i32
  }
  func.func @transform_7(%arg0: i32, %arg1: i32) -> (i32, i32, i32) {
    %c0_i32 = arith.constant 0 : i32
    %c0_i32_0 = arith.constant 0 : i32
    %c0_i32_1 = arith.constant 0 : i32
    return %arg1, %c0_i32, %c0_i32_0 : i32, i32, i32
  }
  func.func @transform_8(%arg0: i32, %arg1: i32) -> (i32, i32, i32) {
    %c0_i32 = arith.constant 0 : i32
    %c0_i32_0 = arith.constant 0 : i32
    %c0_i32_1 = arith.constant 0 : i32
    return %arg1, %c0_i32, %c0_i32_0 : i32, i32, i32
  }
  func.func @transform_9(%arg0: i32, %arg1: i32) -> (i32, i32, i32) {
    %c0_i32 = arith.constant 0 : i32
    %c0_i32_0 = arith.constant 0 : i32
    %c0_i32_1 = arith.constant 0 : i32
    return %arg1, %c0_i32, %c0_i32_0 : i32, i32, i32
  }
  func.func @transform_10(%arg0: i32, %arg1: i32) -> (i32, i32, i32) {
    %c0_i32 = arith.constant 0 : i32
    %c0_i32_0 = arith.constant 0 : i32
    %c0_i32_1 = arith.constant 0 : i32
    return %arg1, %c0_i32, %c0_i32_0 : i32, i32, i32
  }
  func.func @transform_11(%arg0: i32, %arg1: i32) -> (i32, i32, i32) {
    %c0_i32 = arith.constant 0 : i32
    %c0_i32_0 = arith.constant 0 : i32
    %c0_i32_1 = arith.constant 0 : i32
    return %arg1, %c0_i32, %c0_i32_0 : i32, i32, i32
  }
  func.func @transform_12(%arg0: i32, %arg1: i32) -> (i32, i32, i32) {
    %c0_i32 = arith.constant 0 : i32
    %c0_i32_0 = arith.constant 0 : i32
    %c0_i32_1 = arith.constant 0 : i32
    return %arg1, %c0_i32, %c0_i32_0 : i32, i32, i32
  }
  func.func @transform_13(%arg0: i32, %arg1: i32) -> (i32, i32) {
    %c0_i32 = arith.constant 0 : i32
    %c0_i32_0 = arith.constant 0 : i32
    %c0_i32_1 = arith.constant 0 : i32
    return %c0_i32, %c0_i32_0 : i32, i32
  }
  func.func @transform_14(%arg0: i32, %arg1: i32) -> (i32, i32) {
    %c0_i32 = arith.constant 0 : i32
    %c0_i32_0 = arith.constant 0 : i32
    %c0_i32_1 = arith.constant 0 : i32
    return %c0_i32, %c0_i32_0 : i32, i32
  }
  func.func @transform_15(%arg0: i32, %arg1: i32) -> (i32, i32, i32) {
    %c0_i32 = arith.constant 0 : i32
    %c0_i32_0 = arith.constant 0 : i32
    %c0_i32_1 = arith.constant 0 : i32
    return %arg0, %c0_i32, %c0_i32_0 : i32, i32, i32
  }
}

</mosaic_0001>

<bundles_post_ra>
// kernel: tpu_custom_call.1
= control target key start
LH: loop header
LB: loop body
LE: loop exit
PB: predicated region body
PF: predicated region fallthrough
CT: control target
= control target key end

     0   :  { %s2671_s0 = inlined_call_operand.hbm [shape: f32[2,8,32], index: 0, kind: input, shape index: {}]   ;;  %s2672_s1 = inlined_call_operand.vmem [shape: bf16[2,32,96], index: 1, kind: input, shape index: {}]   ;;  %s2673_s2 = inlined_call_operand.vmem [shape: f32[2,1,96], index: 2, kind: input, shape index: {}]   ;;  %s2674_s3 = inlined_call_operand.vmem [shape: bf16[2,32,32], index: 3, kind: input, shape index: {}]   ;;  %s2675_s4 = inlined_call_operand.vmem [shape: f32[2,1,32], index: 4, kind: input, shape index: {}]   ;;  %s2676_s5 = inlined_call_operand.vmem [shape: f32[2,1,32], index: 5, kind: input, shape index: {}]   ;;  %s2677_s6 = inlined_call_operand.vmem [shape: f32[2,1,32], index: 6, kind: input, shape index: {}]   ;;  %s2678_s7 = inlined_call_operand.vmem [shape: bf16[2,32,64], index: 7, kind: input, shape index: {}]   ;;  %s2679_s8 = inlined_call_operand.vmem [shape: f32[2,1,64], index: 8, kind: input, shape index: {}]   ;;  %s2680_s9 = inlined_call_operand.vmem [shape: bf16[2,64,32], index: 9, kind: input, shape index: {}]   ;;  %s2681_s10 = inlined_call_operand.vmem [shape: f32[2,1,32], index: 10, kind: input, shape index: {}]   ;;  %s2682_s11 = inlined_call_operand.vmem [shape: f32[2,1,32], index: 11, kind: input, shape index: {}]   ;;  %s2683_s12 = inlined_call_operand.vmem [shape: f32[2,1,32], index: 12, kind: input, shape index: {}]   ;;  %s2684_s13 = inlined_call_operand.vmem [shape: f32[1,32], index: 13, kind: input, shape index: {}]   ;;  %s2685_s14 = inlined_call_operand.vmem [shape: f32[1,32], index: 14, kind: input, shape index: {}]   ;;  %s2686_s15 = inlined_call_operand.hbm [shape: f32[2,8,32], index: 15, kind: output, shape index: {}]  }
   0x1   :  { %2700 = sst [smem:[#allocation22_spill]] %s2671_s0 }
   0x2   :  { %2701 = sst [smem:[#allocation23_spill]] %s2672_s1 }
   0x3   :  { %2702 = sst [smem:[#allocation24_spill]] %s2674_s3 }
   0x4   :  { %2703 = sst [smem:[#allocation25_spill]] %s2677_s6 }
   0x5   :  { %2704 = sst [smem:[#allocation26_spill]] %s2678_s7 }
   0x6   :  { %2705 = sst [smem:[#allocation27_spill]] %s2681_s10 }
   0x7   :  { %2706 = sst [smem:[#allocation28_spill]] %s2682_s11 }
   0x8   :  { %2707 = sst [smem:[#allocation29_spill]] %s2683_s12 }
   0x9   :  { %2708 = sst [smem:[#allocation30_spill]] %s2684_s13 }
   0xa   :  { %2709 = sst [smem:[#allocation31_spill]] %s2685_s14 }
   0xb   :  { %2710 = sst [smem:[#allocation32_spill]] %s2686_s15 }
   0xc   :  { %20 = vsyncpa [#allocation4], 0 }
   0xd   :  { %22 = vsyncpa [#allocation4 + $0x1], 0 }
   0xe   :  { %23 = vsyncpa [#allocation5], 0 }
   0xf   :  { %25 = vsyncpa [#allocation5 + $0x1], 0  ;;  %s2301_s18 = smov 0   ;;  %s2303_s19 = smov 0  }
  0x10   :  { %s2305_s20 = smov 0   ;;  %s2307_s21 = smov 0  }
  0x11   :  { %s2309_s22 = smov 0   ;;  %s2311_s23 = smov 0  }
  0x12   :  { %s2313_s24 = smov 0   ;;  %s2315_s25 = smov 0  }
  0x13 LB: > { %2711 = sst [smem:[#allocation9_spill]] %s2179_s18  ;;  %s1790_s26 = sadd.s32 4294967295, %s2207_s25   ;;  %s2207_s25 = sphi %s2315_s25, %s31_s25   ;;  %s2203_s24 = sphi %s2313_s24, %s2761_s24   ;;  %s2199_s23 = sphi %s2311_s23, %s2760_s23   ;;  %s2195_s22 = sphi %s2309_s22, %s2759_s22   ;;  %s2191_s21 = sphi %s2307_s21, %s2758_s21   ;;  %s2187_s20 = sphi %s2305_s20, %s2757_s20   ;;  %s2183_s19 = sphi %s2303_s19, %s2756_s19   ;;  %s2179_s18 = sphi %s2301_s18, %s2755_s18  }
  0x14   : > { %2712 = sst [smem:[#allocation10_spill]] %s2183_s19  ;;  %s1791_s27 = sadd.s32 4294967294, %s2207_s25  }
  0x15   : > { %2713 = sst [smem:[#allocation11_spill]] %s2187_s20  ;;  %s40_s28 = sadd.s32 1, %s2199_s23 }
  0x16   : > { %2714 = sst [smem:[#allocation12_spill]] %s2195_s22  ;;  %s43_s29 = sadd.s32 1, %s2203_s24 }
  0x17   : > { %2715 = sst [smem:[#allocation13_spill]] %s2199_s23  ;;  %p41_p0 = scmp.ge.s32.totalorder %s40_s28, 2 }
  0x18   : > { %2716 = sst [smem:[#allocation14_spill]] %s2203_s24  ;;  %s50_s30 = sadd.s32 1, %s2187_s20 }
  0x19   : > { %2717 = sst [smem:[#allocation15_spill]] %s2207_s25  ;;  %p57_p1 = scmp.ne.s32.totalorder %s2187_s20, %s2183_s19 }
  0x1a   : > { %p58_p2 = scmp.eq.s32.totalorder %s2207_s25, 0  ;;  %s2763_s28 = smov (%p41_p0, %s40_s28), 0 }
  0x1b   : > { %2718 = sst [smem:[#allocation16_spill]] %s2763_s28  ;;  %s2765_s29 = smov (!%p41_p0, %s43_s29), %s2203_s24 }
  0x1c   : > { %p2352_p3 = por %p58_p2, %p57_p1  ;;  %p63_p4 = scmp.ne.s32.totalorder %s2183_s19, %s2179_s18 }
  0x1d   : > { %p45_p5 = scmp.ge.s32.totalorder %s2765_s29, 2  ;;  %p64_p6 = scmp.eq.s32.totalorder %s1790_s26, 0 }
  0x1e   : > { %p441_p7 = scmp.eq.s32.totalorder %s1790_s26, 3  ;;  %p447_p8 = scmp.eq.s32.totalorder %s1791_s27, 3 }
  0x1f   : > { %s2767_s29 = smov (%p45_p5, %s2765_s29), 0  ;;  %p2360_p9 = por %p64_p6, %p63_p4 }
  0x20   : > { %2720 = sst [smem:[#allocation17_spill]] %s2767_s29  ;;  %p2364_p10 = por %p441_p7, %p57_p1 }
  0x21   : > { %s47_s23 = ssub.s32 %s2203_s24, %s2767_s29  ;;  %p2370_p11 = por %p447_p8, %p63_p4 }
  0x22   : > { %s2722_s28 = scalar_select %p2364_p10, 1, 0 }
  0x23   : > { %s2724_s18 = scalar_select %p2370_p11, 1, 0 }
  0x24   : > { %2723 = sst [smem:[#allocation18_spill]] %s2722_s28  ;;  %p48_p12 = scmp.eq.s32.totalorder %s47_s23, 0 }
  0x25   : > { %2725 = sst [smem:[#allocation19_spill]] %s2724_s18  ;;  %p1975_p13 = scmp.lt.s32.totalorder %s2207_s25, 4 }
  0x26   : > { %s473_s26 = sand.u32 1, %s2187_s20   ;;  %s1795_s22 = sshll.u32 %s2203_s24, 7 }
  0x27   : > { %s2377_s27 = scalar_select %p48_p12, %s2187_s20, %s50_s30  }
  0x28   : > { %s1794_s15 = sshll.u32 %s473_s26, 3  ;;  %s2727_s0 = sld [smem:[#allocation22_spill]] }
  0x29   : > { %2726 = sst [smem:[#allocation20_spill]] %s2377_s27  ;;  %s477_s11 = scalar_lea.vmem [#allocation3], %s1794_s15 }
  0x2a   : > { %s484_s10 = sshll.u32 %s477_s11, 4  ;;  %p2385_p0 = pnand %p1975_p13, %p2352_p3  ;;  %s485_s10 = int_to_ptr.vmem [resolvable:$true] %s484_s10 }
  0x2b   : > { %p1796_p1 = scmp.ge.s32.totalorder %s2207_s25, 1  ;;  %p569_p2 = scmp.lt.s32.totalorder %s2207_s25, 5 }
  0x2c   : > { %s474_s23 = scalar_lea.sflag [#allocation4], %s473_s26  ;;  %p2085_p4 = pneg %p2385_p0 }
  0x2d   : > { %s2096_s30 = scalar_lea.vmem %s485_s10, 128  ;;  %s2209_s13 = smov [#allocation3]  }
  0x2e   : > { %s482_s12 = scalar_lea.hbm %s2727_s0, %s1795_s22  ;;  %p2097_p5 = scmp.ne.s32.totalorder %s485_s10, %s2096_s30 }
  0x2f   : > { %s2101_s14 = sshll.u32 %s2209_s13, 4  ;;  %s2102_s14 = int_to_ptr.vmem [resolvable:$false] %s2101_s14 }
  0x30   : > { %p2099_p6 = pnand %p2097_p5, %p2085_p4  ;;  %s2103_s11 = scalar_lea.vmem %s2102_s14, 256 }
  0x31   : > { %p2104_p8 = scmp.lt.s32.totalorder %s485_s10, %s2102_s14  ;;  %p2105_p12 = scmp.lt.s32.totalorder %s2103_s11, %s2096_s30 }
  0x32   : > { %p2100_p7 = pneg %p2099_p6 }
  0x33   : > { %p2106_p3 = por %p2105_p12, %p2104_p8 }
  0x35   : > { %p2107_p13 = pnand %p2106_p3, %p2100_p7 }
  0x37   : > { %2110 = shalt.err (!%p2107_p13)
}
  0x38   : > { %1970 = dma.hbm_to_vmem [thread:$0]  (!%p2385_p0), %s482_s12, 128, %s485_s10, %s474_s23  }
  0x39   : > { %p570_p11 = pnand %p1796_p1, %p569_p2 }
  0x3b   : > { %573 = sbr.rel (%p570_p11) target bundleno = 2902 (0xb56), region = 80 }
  0x40   : > { %s2400_s15 = sand.u32 1, %s2183_s19  }
  0x41   : > { %2729 = sst [smem:[#allocation21_spill]] %s2400_s15  ;;  %s1797_s22 = sshll.u32 %s2400_s15, 3 }
  0x42   : > { %s576_s16 = scalar_lea.sflag [#allocation4], %s2400_s15  ;;  %s579_s26 = scalar_lea.vmem [#allocation3], %s1797_s22 }
  0x43   : > { %2170 = dma.done.wait (%p2360_p9), %s576_s16, 128  }
  0x44   : > { %2172 = vsyncadd (%p2360_p9), %s576_s16, 4294967168  ;;  %p670_p0 = scmp.lt.s32.totalorder %s2191_s21, 1  ;;  %s2730_s1 = sld [smem:[#allocation23_spill]] }
  0x45   : > { %s2731_s3 = sld [smem:[#allocation24_spill]]  ;;  %s2464_s11 = scalar_lea.vmem [#allocation6], %s1797_s22 }
  0x46   : > { %s2410_s10 = scalar_select %p670_p0, %s2191_s21, 1 }
  0x47   : > { %s2733_s7 = sld [smem:[#allocation26_spill]]  ;;  %p1807_p9 = scmp.ne.s32.totalorder %s2191_s21, 0 }
  0x48   : > { %s1845_s12 = sshll.u32 %s2410_s10, 4  ;;  %s2734_s25 = sld [smem:[#allocation27_spill]] }
  0x49   : > { %s2735_s15 = sld [smem:[#allocation28_spill]] }
  0x4a   : > { %s674_s14 = scalar_lea.vmem %s2730_s1, %s1845_s12  ;;  %s699_s1 = scalar_lea.vmem %s2679_s8, %s2410_s10 }
  0x4b   : > { %s2423_s0 = scalar_lea.vmem %s2731_s3, %s1845_s12  ;;  %s1848_s3 = sshll.u32 %s2410_s10, 5 }
  0x4c   : > { %s2450_s20 = scalar_lea.vmem %s2680_s9, %s1848_s3 }
  0x4d   : > { %s2440_s13 = scalar_lea.vmem %s2733_s7, %s1845_s12  ;;  %s2736_s7 = sld [smem:[#allocation29_spill]] }
  0x4e   : > { %s707_s28 = scalar_lea.vmem %s2734_s25, %s2410_s10 }
  0x4f   : > { %s710_s17 = scalar_lea.vmem %s2735_s15, %s2410_s10  ;;  %718 = sbr.rel (%p1807_p9) target bundleno = 86 (0x56), region = 88 }
  0x53   : > { %s713_s6 = scalar_lea.vmem %s2736_s7, %s2410_s10 }
  0x54   : > { %v719_v0 = vld [vmem:[%s579_s26] sm:$0xff]  ;;  %vm720_vm0 = vcmask 261120  }
  0x55   : > { %721 = vst.msk [vmem:[#allocation2] sm:$0xff] %vm720_vm0, %v719_v0 }
  0x56 PF: > { %v2051_v1 = vld [vmem:[%s674_s14 + $0x8] sm:$0xff]   ;;  %v2210_v2 = vmov 0.0   ;;  %v2052_v3 = vld [vmem:[%s674_s14] sm:$0xff]   ;;  %vm2211_vm1 = vmmov 0   ;;  %vm747_vm2 = vcmask 261120   ;;  %s2737_s25 = scalar_lea.vmem %s2673_s2, %s2410_s10  ;;  %s2212_s15 = smov 104  }
  0x57   : > { %1879 = vmatprep.subr.bf16.mxu0 %v2210_v2  ;;  %1887 = vmatprep.subr.bf16.mxu1 %v2210_v2  ;;  %v1808_v6 = vld [vmem:[%s2737_s25] ss:$0 sm:$0xff]  ;;  %s2213_s22 = smov 120   ;;  %s2214_s26 = smov 112   ;;  %vm808_vm3 = vcmask 64512   ;;  %vm1055_vm4 = vcmask 1043456  }
  0x58   : > { %1880 = vmatpush3.bf16.msra.mxu0 %v2051_v1  ;;  %1883 = vmatprep.mubr.msk.bf16.mxu0 %vm2211_vm1, %v2210_v2  ;;  %s2215_s14 = smov 96   ;;  %s2216_s23 = smov 64   ;;  %vm1256_vm5 = vcmask 130048   ;;  %vm1258_vm6 = vcmask 195584   ;;  %vm1466_vm7 = vcmask 523264  }
  0x59   : > { %1881 = vmatprep.subr.bf16.mxu0 %v2210_v2  ;;  %1889 = vmatprep.mubr.msk.bf16.mxu1 %vm2211_vm1, %v2210_v2  ;;  %s2217_s16 = smov 8   ;;  %s2218_s24 = smov 16  }
  0x5a   : > { %s2219_s27 = smov 24   ;;  %s2738_s19 = scalar_lea.vmem %s2675_s4, %s2410_s10 }
  0x5b   : > { %s2739_s12 = scalar_lea.vmem %s2676_s5, %s2410_s10  ;;  %s2740_s7 = sld [smem:[#allocation25_spill]] }
  0x5c   : > { %v2471_v4 = vld [vmem:[#allocation2] sm:$0xff]  ;;  %1882 = vmatpush3.bf16.msra.mxu0 %v2052_v3  ;;  %p1838_p11 = scmp.ne.s32.totalorder %s2191_s21, 1 }
  0x5d   : > { %v723_v5 = vpack.c.bf16 %v2471_v4, %v2471_v4  ;;  %1893 = vmatprep.subr.bf16.mxu0 %v2210_v2  ;;  %s2745_s21 = sld [smem:[#allocation30_spill]] (!%p1838_p11) }
  0x5e   : > { %s2746_s18 = sld [smem:[#allocation31_spill]] (!%p1838_p11) }
  0x5f   : > { %1884 = vmatmul.mubr.msk.bf16.vlgmr.msra.gmra.mxu0 %vm747_vm2, %v723_v5 }
  0x60   : > { %1895 = vmatprep.mubr.msk.bf16.mxu0 %vm2211_vm1, %v2210_v2 }
  0x61   : > { %s2741_s25 = scalar_lea.vmem %s2740_s7, %s2410_s10 }
 0x11f   : > { %v785_v7 = vpop.f32.mrf.mxu0 }
 0x120   : > { %v786_v8 = vadd.f32 %v1808_v6, %v785_v7 }
 0x121   : > { %v1885_v9 = vpop.f32.mrf.mxu0 }
 0x122   : > { %798 = vrot.lane.b32.xlu1 %v786_v8, %s2212_s15  ;;  %792 = vrot.lane.b32.xlu0 %v786_v8, %s2213_s22  ;;  %v2487_v11 = vpack.c.bf16 %v786_v8, %v786_v8 }
 0x123   : > { %v788_v10 = vpop.f32.mrf.mxu0 }
 0x125   : > { %v1886_v12 = vpop.f32.mrf.mxu0 }
 0x126   : > { %795 = vrot.lane.b32.xlu0 %v786_v8, %s2214_s26  ;;  %806 = vrot.lane.b32.xlu1 %v2487_v11, %s2215_s14 }
 0x194   : > { %v799_v13 = vpop.permute.xlu1 %798  ;;  %v793_v14 = vpop.permute.xlu0 %792 }
 0x195   : > { %v802_v15 = vpack.c.bf16 %v793_v14, %v793_v14  ;;  %v2490_v18 = vpack.c.bf16 %v799_v13, %v799_v13 }
 0x197   : > { %856 = vrot.lane.b32.xlu0 %v802_v15, %s2215_s14 }
 0x198   : > { %v796_v16 = vpop.permute.xlu0 %795  ;;  %v807_v17 = vpop.permute.xlu1 %806 }
 0x199   : > { %v2492_v19 = vpack.c.bf16 %v796_v16, %v796_v16  ;;  %v813_v20 = vsel %vm808_vm3, %v807_v17, 0 }
 0x19a   : > { %1888 = vmatpush3.bf16.xpose.msra.mxu1 %v813_v20 }
 0x19b   : > { %954 = vrot.lane.b32.xlu0 %v2490_v18, %s2215_s14  ;;  %905 = vrot.lane.b32.xlu1 %v2492_v19, %s2215_s14 }
 0x19c   : > { %1899 = vmatprep.subr.bf16.mxu1 %v2210_v2 }
 0x1a1   : > { %1890 = vmatmul.mubr.msk.bf16.vlgmr.msra.gmra.mxu1 %vm808_vm3, %v2487_v11 }
 0x1a2   : > { %1901 = vmatprep.mubr.msk.bf16.mxu1 %vm2211_vm1, %v2210_v2 }
 0x209   : > { %v857_v21 = vpop.permute.xlu0 %856 }
 0x20a   : > { %v862_v22 = vsel %vm808_vm3, %v857_v21, 0 }
 0x20b   : > { %1894 = vmatpush3.bf16.xpose.msra.mxu0 %v862_v22 }
 0x20c   : > { %1905 = vmatprep.subr.bf16.mxu0 %v2210_v2 }
 0x20d   : > { %v906_v23 = vpop.permute.xlu1 %905  ;;  %v955_v25 = vpop.permute.xlu0 %954 }
 0x20e   : > { %v911_v24 = vsel %vm808_vm3, %v906_v23, 0  ;;  %v960_v26 = vsel %vm808_vm3, %v955_v25, 0 }
 0x20f   : > { %1900 = vmatpush3.bf16.xpose.msra.mxu1 %v911_v24 }
 0x210   : > { %1911 = vmatprep.subr.bf16.mxu1 %v2210_v2 }
 0x212   : > { %1896 = vmatmul.mubr.msk.bf16.vlgmr.msra.gmra.mxu0 %vm808_vm3, %v802_v15 }
 0x213   : > { %1906 = vmatpush3.bf16.xpose.msra.mxu0 %v960_v26  ;;  %1907 = vmatprep.mubr.msk.bf16.mxu0 %vm2211_vm1, %v2210_v2 }
 0x214   : > { %1917 = vmatprep.subr.bf16.mxu0 %v2210_v2 }
 0x216   : > { %1902 = vmatmul.mubr.msk.bf16.vlgmr.msra.gmra.mxu1 %vm808_vm3, %v2492_v19 }
 0x217   : > { %1913 = vmatprep.mubr.msk.bf16.mxu1 %vm2211_vm1, %v2210_v2 }
 0x21a   : > { %1908 = vmatmul.mubr.msk.bf16.vlgmr.msra.gmra.mxu0 %vm808_vm3, %v2490_v18 }
 0x21b   : > { %1919 = vmatprep.mubr.msk.bf16.mxu0 %vm2211_vm1, %v2210_v2 }
 0x261   : > { %v849_v27 = vpop.f32.mrf.mxu1 }
 0x262   : > { %v1002_v28 = vsel %vm808_vm3, %v849_v27, -inf }
 0x263   : > { %1003 = vmax.xlane.f32.xlu1 %v1002_v28  ;;  %v1891_v29 = vpop.f32.mrf.mxu1 }
 0x265   : > { %v852_v30 = vpop.f32.mrf.mxu1 }
 0x267   : > { %v1892_v31 = vpop.f32.mrf.mxu1 }
 0x2d2   : > { %v898_v32 = vpop.f32.mrf.mxu0 }
 0x2d3   : > { %v1005_v33 = vsel %vm808_vm3, %v898_v32, -inf }
 0x2d4   : > { %1006 = vmax.xlane.f32.xlu0 %v1005_v33  ;;  %v1897_v34 = vpop.f32.mrf.mxu0  ;;  %v2053_v33 = vld [vmem:[%s2423_s0 + $0x8] sm:$0xff]  }
 0x2d5   : > { %v2054_v34 = vld [vmem:[%s2423_s0] sm:$0xff]  }
 0x2d6   : > { %v901_v35 = vpop.f32.mrf.mxu0  ;;  %v947_v36 = vpop.f32.mrf.mxu1 }
 0x2d7   : > { %v1008_v37 = vsel %vm808_vm3, %v947_v36, -inf }
 0x2d8   : > { %v1903_v38 = vpop.f32.mrf.mxu1  ;;  %1009 = vmax.xlane.f32.xlu0 %v1008_v37  ;;  %v1898_v39 = vpop.f32.mrf.mxu0 }
 0x2da   : > { %v950_v40 = vpop.f32.mrf.mxu1  ;;  %v996_v41 = vpop.f32.mrf.mxu0 }
 0x2db   : > { %v1011_v42 = vsel %vm808_vm3, %v996_v41, -inf }
 0x2dc   : > { %v1904_v43 = vpop.f32.mrf.mxu1  ;;  %1012 = vmax.xlane.f32.xlu1 %v1011_v42  ;;  %v1909_v44 = vpop.f32.mrf.mxu0 }
 0x2de   : > { %v999_v45 = vpop.f32.mrf.mxu0 }
 0x2e0   : > { %v1910_v46 = vpop.f32.mrf.mxu0 }
 0x2ec   : > { %v1004_v47 = vpop.xlane.xlu1 %1003 }
 0x2ed   : > { %1099 = vrot.lane.b32.xlu1 %v802_v15, %s2216_s23  ;;  %v1014_v48 = vsub.f32 %v849_v27, %v1004_v47 }
 0x2ee   : > { %1050 = vrot.lane.b32.xlu0 %v2487_v11, %s2216_s23 }
 0x2ef   : > { %v1018_v49 = vmul.f32 1.442695, %v1014_v48 }
 0x2f1   : > { %2061 = vpow2.f32 %v1018_v49 }
 0x2fe   : > { %v2062_v50 = vpop.eup %2061 }
 0x2ff   : > { %v1026_v51 = vsel %vm808_vm3, %v2062_v50, 0.0 }
 0x30d   : > { %1027 = vadd.xlane.f32.xlu0 %v1026_v51 }
 0x35d   : > { %v1007_v52 = vpop.xlane.xlu0 %1006 }
 0x35e   : > { %v1015_v53 = vsub.f32 %v898_v32, %v1007_v52 }
 0x360   : > { %v1020_v54 = vmul.f32 1.442695, %v1015_v53 }
 0x361   : > { %v1010_v55 = vpop.xlane.xlu0 %1009 }
 0x362   : > { %2063 = vpow2.f32 %v1020_v54  ;;  %v1016_v56 = vsub.f32 %v947_v36, %v1010_v55  ;;  %v1820_v54 = vld [vmem:[%s2738_s19] ss:$0 sm:$0xff] }
 0x364   : > { %v1022_v57 = vmul.f32 1.442695, %v1016_v56 }
 0x365   : > { %v1051_v58 = vpop.permute.xlu0 %1050  ;;  %v1013_v59 = vpop.xlane.xlu1 %1012 }
 0x366   : > { %2065 = vpow2.f32 %v1022_v57  ;;  %v1057_v60 = vsel %vm1055_vm4, %v1051_v58, 0  ;;  %v1017_v61 = vsub.f32 %v996_v41, %v1013_v59 }
 0x367   : > { %1912 = vmatpush3.bf16.msra.mxu1 %v1057_v60 }
 0x368   : > { %v1024_v62 = vmul.f32 1.442695, %v1017_v61  ;;  %1923 = vmatprep.subr.bf16.mxu1 %v2210_v2 }
 0x369   : > { %v1100_v63 = vpop.permute.xlu1 %1099 }
 0x36a   : > { %2067 = vpow2.f32 %v1024_v62  ;;  %v1105_v0 = vsel %vm1055_vm4, %v1100_v63, 0 }
 0x36b   : > { %1918 = vmatpush3.bf16.msra.mxu0 %v1105_v0 }
 0x36c   : > { %1929 = vmatprep.subr.bf16.mxu0 %v2210_v2 }
 0x36f   : > { %v2064_v1 = vpop.eup %2063 }
 0x370   : > { %v1029_v3 = vsel %vm808_vm3, %v2064_v1, 0.0 }
 0x371   : > { %1030 = vadd.xlane.f32.xlu1 %v1029_v3 }
 0x373   : > { %v2066_v5 = vpop.eup %2065 }
 0x374   : > { %v1032_v6 = vsel %vm808_vm3, %v2066_v5, 0.0 }
 0x375   : > { %1033 = vadd.xlane.f32.xlu0 %v1032_v6  ;;  %v2056_v6 = vld [vmem:[%s2440_s13] sm:$0xff]  }
 0x377   : > { %v2068_v7 = vpop.eup %2067 }
 0x378   : > { %v1035_v8 = vsel %vm808_vm3, %v2068_v7, 0.0 }
 0x379   : > { %1036 = vadd.xlane.f32.xlu1 %v1035_v8 }
 0x38a   : > { %1147 = vrot.lane.b32.xlu1 %v2492_v19, %s2216_s23 }
 0x38b   : > { %1195 = vrot.lane.b32.xlu0 %v2490_v18, %s2216_s23 }
 0x396   : > { %v1028_v9 = vpop.xlane.xlu0 %1027 }
 0x397   : > { %2069 = vrcp.f32 %v1028_v9 }
 0x3a4   : > { %v2070_v10 = vpop.eup %2069 }
 0x3a5   : > { %v1042_v11 = vmul.f32 %v2070_v10, %v2062_v50 }
 0x3a7   : > { %v1046_v12 = vpack.c.bf16 %v1042_v11, %v1042_v11 }
 0x3a9   : > { %1914 = vmatmul.mubr.msk.bf16.vlgmr.msra.gmra.mxu1 %vm808_vm3, %v1046_v12  ;;  %v1824_v12 = vld [vmem:[%s2739_s12] ss:$0 sm:$0xff] }
 0x3aa   : > { %1925 = vmatprep.mubr.msk.bf16.mxu1 %vm2211_vm1, %v2210_v2 }
 0x3fa   : > { %v1031_v13 = vpop.xlane.xlu1 %1030 }
 0x3fb   : > { %2071 = vrcp.f32 %v1031_v13 }
 0x3fe   : > { %v1034_v14 = vpop.xlane.xlu0 %1033 }
 0x3ff   : > { %2073 = vrcp.f32 %v1034_v14  ;;  %v1825_v14 = vld [vmem:[%s2741_s25] ss:$0 sm:$0xff] }
 0x402   : > { %v1037_v15 = vpop.xlane.xlu1 %1036  ;;  %v1196_v20 = vpop.permute.xlu0 %1195 }
 0x403   : > { %2075 = vrcp.f32 %v1037_v15  ;;  %v1201_v23 = vsel %vm1055_vm4, %v1196_v20, 0  ;;  %v1826_v20 = vld [vmem:[%s699_s1] ss:$0 sm:$0xff] }
 0x406   : > { %v1148_v16 = vpop.permute.xlu1 %1147 }
 0x407   : > { %v1153_v17 = vsel %vm1055_vm4, %v1148_v16, 0 }
 0x408   : > { %v2072_v18 = vpop.eup %2071  ;;  %1924 = vmatpush3.bf16.msra.mxu1 %v1153_v17 }
 0x409   : > { %v1043_v19 = vmul.f32 %v2072_v18, %v2064_v1  ;;  %1935 = vmatprep.subr.bf16.mxu1 %v2210_v2  ;;  %v2059_v18 = vld [vmem:[%s2450_s20 + $0x8] sm:$0xff]  }
 0x40b   : > { %v1047_v21 = vpack.c.bf16 %v1043_v19, %v1043_v19  ;;  %v2060_v19 = vld [vmem:[%s2450_s20] sm:$0xff]  }
 0x40c   : > { %v2074_v22 = vpop.eup %2073 }
 0x40d   : > { %1920 = vmatmul.mubr.msk.bf16.vlgmr.msra.gmra.mxu0 %vm808_vm3, %v1047_v21  ;;  %v1044_v24 = vmul.f32 %v2074_v22, %v2066_v5  ;;  %v2055_v5 = vld [vmem:[%s2440_s13 + $0x8] sm:$0xff]  }
 0x40e   : > { %1930 = vmatpush3.bf16.msra.mxu0 %v1201_v23  ;;  %1931 = vmatprep.mubr.msk.bf16.mxu0 %vm2211_vm1, %v2210_v2 }
 0x40f   : > { %v1048_v25 = vpack.c.bf16 %v1044_v24, %v1044_v24  ;;  %1943 = vmatprep.subr.bf16.mxu0 %v2210_v2 }
 0x410   : > { %v2076_v26 = vpop.eup %2075 }
 0x411   : > { %1926 = vmatmul.mubr.msk.bf16.vlgmr.msra.gmra.mxu1 %vm808_vm3, %v1048_v25  ;;  %v1045_v27 = vmul.f32 %v2076_v26, %v2068_v7  ;;  %v2058_v7 = vld [vmem:[%s2450_s20 + $0x10] sm:$0xff]  }
 0x412   : > { %1939 = vmatprep.mubr.msk.bf16.mxu1 %vm2211_vm1, %v2210_v2  ;;  %1936 = vmatpush3.bf16.msra.mxu1 %v2053_v33 }
 0x413   : > { %v1049_v28 = vpack.c.bf16 %v1045_v27, %v1045_v27  ;;  %1937 = vmatprep.subr.bf16.mxu1 %v2210_v2 }
 0x415   : > { %1932 = vmatmul.mubr.msk.bf16.vlgmr.msra.gmra.mxu0 %vm808_vm3, %v1049_v28 }
 0x416   : > { %1947 = vmatprep.mubr.msk.bf16.mxu0 %vm2211_vm1, %v2210_v2  ;;  %1938 = vmatpush3.bf16.msra.mxu1 %v2054_v34 }
 0x417   : > { %1951 = vmatprep.subr.bf16.mxu1 %v2210_v2  ;;  %1944 = vmatpush3.bf16.msra.mxu0 %v2055_v5 }
 0x418   : > { %1945 = vmatprep.subr.bf16.mxu0 %v2210_v2 }
 0x41b   : > { %1946 = vmatpush3.bf16.msra.mxu0 %v2056_v6 }
 0x469   : > { %v1093_v29 = vpop.f32.mrf.mxu1 }
 0x46b   : > { %v1915_v30 = vpop.f32.mrf.mxu1 }
 0x46d   : > { %v1096_v31 = vpop.f32.mrf.mxu1 }
 0x46f   : > { %v1916_v32 = vpop.f32.mrf.mxu1 }
 0x4cd   : > { %v1141_v35 = vpop.f32.mrf.mxu0 }
 0x4ce   : > { %1244 = vrot.lane.b32.xlu1 %v1141_v35, %s2217_s16 }
 0x4cf   : > { %v1921_v36 = vpop.f32.mrf.mxu0 }
 0x4d1   : > { %v1144_v37 = vpop.f32.mrf.mxu0  ;;  %v1189_v38 = vpop.f32.mrf.mxu1 }
 0x4d2   : > { %1248 = vrot.lane.b32.xlu0 %v1189_v38, %s2218_s24 }
 0x4d3   : > { %v1922_v39 = vpop.f32.mrf.mxu0  ;;  %v1927_v40 = vpop.f32.mrf.mxu1 }
 0x4d5   : > { %v1192_v41 = vpop.f32.mrf.mxu1  ;;  %v1237_v42 = vpop.f32.mrf.mxu0 }
 0x4d6   : > { %1252 = vrot.lane.b32.xlu1 %v1237_v42, %s2219_s27 }
 0x4d7   : > { %v1928_v43 = vpop.f32.mrf.mxu1  ;;  %v1933_v44 = vpop.f32.mrf.mxu0 }
 0x4d8   : > { %v1836_v44 = vld [vmem:[%s710_s17] ss:$0 sm:$0xff] }
 0x4d9   : > { %v1240_v45 = vpop.f32.mrf.mxu0 }
 0x4db   : > { %v1934_v46 = vpop.f32.mrf.mxu0 }
 0x4dc   : > { %v1837_v46 = vld [vmem:[%s713_s6] ss:$0 sm:$0xff] }
 0x540   : > { %v1245_v47 = vpop.permute.xlu1 %1244 }
 0x541   : > { %v1255_v49 = vsel %vm808_vm3, %v1093_v29, %v1245_v47 }
 0x544   : > { %v1249_v48 = vpop.permute.xlu0 %1248 }
 0x545   : > { %v1257_v50 = vsel %vm1256_vm5, %v1255_v49, %v1249_v48 }
 0x548   : > { %v1253_v51 = vpop.permute.xlu1 %1252 }
 0x549   : > { %v1259_v52 = vsel %vm1258_vm6, %v1257_v50, %v1253_v51 }
 0x54a   : > { %v1260_v53 = vpack.c.bf16 %v1259_v52, %v1259_v52 }
 0x54c   : > { %1940 = vmatmul.mubr.msk.bf16.vlgmr.msra.gmra.mxu1 %vm747_vm2, %v1260_v53 }
 0x54d   : > { %1959 = vmatprep.mubr.msk.bf16.mxu1 %vm2211_vm1, %v2210_v2 }
 0x60c   : > { %v1321_v55 = vpop.f32.mrf.mxu1 }
 0x60d   : > { %v1322_v56 = vadd.f32 %v1820_v54, %v1321_v55 }
 0x60e   : > { %v1941_v57 = vpop.f32.mrf.mxu1 }
 0x60f   : > { %v1327_v58 = vadd.f32 %v1322_v56, %v2471_v4  ;;  %v2057_v4 = vld [vmem:[%s2450_s20 + $0x18] sm:$0xff]  }
 0x610   : > { %v1324_v59 = vpop.f32.mrf.mxu1  ;;  %1952 = vmatpush3.bf16.msra.mxu1 %v2057_v4 }
 0x611   : > { %v1330_v60 = vsel %vm747_vm2, %v1327_v58, 0.0  ;;  %1953 = vmatprep.subr.bf16.mxu1 %v2210_v2 }
 0x612   : > { %1331 = vadd.xlane.f32.xlu0 %v1330_v60  ;;  %v1942_v61 = vpop.f32.mrf.mxu1 }
 0x614   : > { %1954 = vmatpush3.bf16.msra.mxu1 %v2058_v7 }
 0x615   : > { %1955 = vmatprep.subr.bf16.mxu1 %v2210_v2 }
 0x618   : > { %1956 = vmatpush3.bf16.msra.mxu1 %v2059_v18 }
 0x619   : > { %1957 = vmatprep.subr.bf16.mxu1 %v2210_v2  ;;  %v1830_v2 = vld [vmem:[%s707_s28] ss:$0 sm:$0xff] }
 0x61c   : > { %1958 = vmatpush3.bf16.msra.mxu1 %v2060_v19 }
 0x69b   : > { %v1332_v62 = vpop.xlane.xlu0 %1331 }
 0x69c   : > { %v1334_v63 = vmul.f32 0.03125, %v1332_v62 }
 0x69e   : > { %v1335_v0 = vsub.f32 %v1327_v58, %v1334_v63 }
 0x6a0   : > { %v1336_v1 = vmul.f32 %v1335_v0, %v1335_v0 }
 0x6a2   : > { %v1337_v3 = vsel %vm747_vm2, %v1336_v1, 0.0 }
 0x6a3   : > { %1338 = vadd.xlane.f32.xlu1 %v1337_v3 }
 0x72c   : > { %v1339_v8 = vpop.xlane.xlu1 %1338 }
 0x72d   : > { %v1340_v9 = vmul.f32 0.03125, %v1339_v8 }
 0x72f   : > { %v1341_v10 = vadd.f32 1e-05, %v1340_v9 }
 0x731   : > { %2077 = vrsqrt.f32 %v1341_v10 }
 0x73e   : > { %v2078_v11 = vpop.eup %2077 }
 0x73f   : > { %v1343_v13 = vmul.f32 %v2078_v11, %v1335_v0 }
 0x741   : > { %v1350_v15 = vmul.f32 %v1824_v12, %v1343_v13 }
 0x743   : > { %v1357_v16 = vadd.f32 %v1825_v14, %v1350_v15 }
 0x745   : > { %v1358_v17 = vpack.c.bf16 %v1357_v16, %v1357_v16 }
 0x747   : > { %1948 = vmatmul.mubr.msk.bf16.vlgmr.msra.gmra.mxu0 %vm747_vm2, %v1358_v17 }
 0x807   : > { %v1419_v21 = vpop.f32.mrf.mxu0 }
 0x808   : > { %v1420_v22 = vadd.f32 %v1826_v20, %v1419_v21 }
 0x809   : > { %v1949_v23 = vpop.f32.mrf.mxu0 }
 0x80a   : > { %v1425_v24 = vmax.f32 %v1420_v22, 0.0 }
 0x80b   : > { %v1422_v25 = vpop.f32.mrf.mxu0 }
 0x80c   : > { %v1426_v26 = vpack.c.bf16 %v1425_v24, %v1425_v24 }
 0x80d   : > { %v1950_v27 = vpop.f32.mrf.mxu0 }
 0x80e   : > { %1960 = vmatmul.mubr.msk.bf16.vlgmr.msra.gmra.mxu1 %vm1466_vm7, %v1426_v26 }
 0x8ce   : > { %v1504_v28 = vpop.f32.mrf.mxu1 }
 0x8cf   : > { %v1505_v29 = vadd.f32 %v1830_v2, %v1504_v28 }
 0x8d0   : > { %v1961_v30 = vpop.f32.mrf.mxu1 }
 0x8d1   : > { %v1510_v31 = vadd.f32 %v1505_v29, %v1357_v16 }
 0x8d2   : > { %v1507_v32 = vpop.f32.mrf.mxu1 }
 0x8d3   : > { %v1513_v33 = vsel %vm747_vm2, %v1510_v31, 0.0 }
 0x8d4   : > { %1514 = vadd.xlane.f32.xlu0 %v1513_v33  ;;  %v1962_v34 = vpop.f32.mrf.mxu1 }
 0x95d   : > { %v1515_v35 = vpop.xlane.xlu0 %1514 }
 0x95e   : > { %v1516_v36 = vmul.f32 0.03125, %v1515_v35 }
 0x960   : > { %v1517_v37 = vsub.f32 %v1510_v31, %v1516_v36 }
 0x962   : > { %v1518_v38 = vmul.f32 %v1517_v37, %v1517_v37 }
 0x964   : > { %v1519_v39 = vsel %vm747_vm2, %v1518_v38, 0.0 }
 0x965   : > { %1520 = vadd.xlane.f32.xlu0 %v1519_v39 }
 0x9ee   : > { %v1521_v40 = vpop.xlane.xlu0 %1520 }
 0x9ef   : > { %v1522_v41 = vmul.f32 0.03125, %v1521_v40 }
 0x9f1   : > { %v1523_v42 = vadd.f32 1e-05, %v1522_v41 }
 0x9f3   : > { %2079 = vrsqrt.f32 %v1523_v42 }
 0xa00   : > { %v2080_v43 = vpop.eup %2079 }
 0xa01   : > { %v1525_v45 = vmul.f32 %v2080_v43, %v1517_v37 }
 0xa03   : > { %v1532_v47 = vmul.f32 %v1836_v44, %v1525_v45  ;;  %1544 = sbr.rel (%p1838_p11) target bundleno = 2877 (0xb3d), region = 92 }
 0xa05   : > { %v1539_v48 = vadd.f32 %v1837_v46, %v1532_v47 }
 0xa07   : > { %1540 = vst.msk [vmem:[#allocation2] sm:$0xff] %vm747_vm2, %v1539_v48 }
 0xa08   : > { %v1547_v49 = vsel %vm747_vm2, %v1539_v48, 0.0  ;;  %v1839_v59 = vld [vmem:[%s2745_s21] ss:$0 sm:$0xff] }
 0xa09   : > { %1548 = vadd.xlane.f32.xlu0 %v1547_v49  ;;  %v1840_v61 = vld [vmem:[%s2746_s18] ss:$0 sm:$0xff] }
 0xa92   : > { %v1549_v50 = vpop.xlane.xlu0 %1548 }
 0xa93   : > { %v1550_v51 = vmul.f32 0.03125, %v1549_v50 }
 0xa95   : > { %v1551_v52 = vsub.f32 %v1539_v48, %v1550_v51 }
 0xa97   : > { %v1552_v53 = vmul.f32 %v1551_v52, %v1551_v52 }
 0xa99   : > { %v1553_v54 = vsel %vm747_vm2, %v1552_v53, 0.0 }
 0xa9a   : > { %1554 = vadd.xlane.f32.xlu0 %v1553_v54 }
 0xb23   : > { %v1555_v55 = vpop.xlane.xlu0 %1554 }
 0xb24   : > { %v1556_v56 = vmul.f32 0.03125, %v1555_v55 }
 0xb26   : > { %v1557_v57 = vadd.f32 1e-05, %v1556_v56 }
 0xb28   : > { %2081 = vrsqrt.f32 %v1557_v57 }
 0xb35   : > { %v2082_v58 = vpop.eup %2081 }
 0xb36   : > { %v1559_v60 = vmul.f32 %v2082_v58, %v1551_v52 }
 0xb38   : > { %v1566_v62 = vmul.f32 %v1839_v59, %v1559_v60 }
 0xb3a   : > { %v1573_v63 = vadd.f32 %v1840_v61, %v1566_v62 }
 0xb3c   : > { %1574 = vst.msk [vmem:[%s2464_s11] sm:$0xff] %vm747_vm2, %v1573_v63 }
 0xb3d PF: > { %s2747_s19 = sld [smem:[#allocation12_spill]]  ;;  %s1589_s15 = sshll.u32 %s2464_s11, 4  ;;  %s1590_s15 = int_to_ptr.vmem [resolvable:$true] %s1589_s15 }
 0xb3e   : > { %s2748_s13 = sld [smem:[#allocation21_spill]]  ;;  %s2111_s26 = scalar_lea.vmem %s1590_s15, 128 }
 0xb3f   : > { %s2750_s7 = sld [smem:[#allocation32_spill]]  ;;  %p2112_p1 = scmp.ne.s32.totalorder %s1590_s15, %s2111_s26 }
 0xb40   : > { %s2220_s14 = smov [#allocation6]  }
 0xb41   : > { %p2113_p2 = pnand %p2112_p1, %p2364_p10  ;;  %s2115_s23 = sshll.u32 %s2220_s14, 4  ;;  %s2116_s23 = int_to_ptr.vmem [resolvable:$false] %s2115_s23 }
 0xb42   : > { %s2117_s1 = scalar_lea.vmem %s2116_s23, 256  ;;  %p2118_p5 = scmp.lt.s32.totalorder %s1590_s15, %s2116_s23 }
 0xb43   : > { %s1842_s12 = sshll.u32 %s2747_s19, 7  ;;  %p2114_p4 = pneg %p2113_p2 }
 0xb44   : > { %s1576_s22 = scalar_lea.sflag [#allocation5], %s2748_s13  ;;  %p2119_p6 = scmp.lt.s32.totalorder %s2117_s1, %s2111_s26 }
 0xb45   : > { %s1587_s25 = scalar_lea.hbm %s2750_s7, %s1842_s12 }
 0xb46   : > { %p2120_p7 = por %p2119_p6, %p2118_p5 }
 0xb48   : > { %p2121_p8 = pnand %p2120_p7, %p2114_p4 }
 0xb4a   : > { %2124 = shalt.err (!%p2121_p8)
}
 0xb4b   : > { %s2125_s20 = scalar_lea.hbm %s1587_s25, 128  ;;  %s2129_s16 = scalar_lea.hbm %s2750_s7, 256 }
 0xb4c   : > { %p2126_p12 = scmp.ne.s32.totalorder %s1587_s25, %s2125_s20  ;;  %p2130_p0 = scmp.lt.s32.totalorder %s1587_s25, %s2750_s7 }
 0xb4d   : > { %p2131_p9 = scmp.lt.s32.totalorder %s2129_s16, %s2125_s20 }
 0xb4e   : > { %p2127_p3 = pnand %p2126_p12, %p2364_p10 }
 0xb4f   : > { %p2132_p11 = por %p2131_p9, %p2130_p0 }
 0xb50   : > { %p2128_p13 = pneg %p2127_p3 }
 0xb52   : > { %p2133_p1 = pnand %p2132_p11, %p2128_p13 }
 0xb54   : > { %2136 = shalt.err (!%p2133_p1)
}
 0xb55   : > { %1965 = dma.vmem_to_hbm [thread:$0]  (%p2364_p10), %s1590_s15, 128, %s1587_s25, %s1576_s22  }
 0xb56 PF: > { %s2751_s6 = sld [smem:[#allocation15_spill]] }
 0xb57   : > { %s2752_s10 = sld [smem:[#allocation9_spill]] }
 0xb58   : > { %s2753_s21 = sld [smem:[#allocation19_spill]] }
 0xb5c   : > { %p1976_p2 = scmp.ge.s32.totalorder %s2751_s6, 2 }
 0xb5d   : > { %s1601_s17 = sand.u32 1, %s2752_s10  }
 0xb5e   : > { %p2754_p4 = scmp.ne.s32.totalorder %s2753_s21, 0  ;;  %s1602_s0 = scalar_lea.sflag [#allocation5], %s1601_s17 }
 0xb60   : > { %p1972_p5 = pnand %p1976_p2, %p2754_p4 }
 0xb62   : > { %p1973_p6 = pneg %p1972_p5 }
 0xb64   : > { %2174 = dma.done.wait (%p1973_p6), %s1602_s0, 128  }
 0xb65   : > { %2176 = vsyncadd (%p1973_p6), %s1602_s0, 4294967168  ;;  %s31_s25 = sadd.s32 1, %s2751_s6   ;;  %s2755_s18 = sld [smem:[#allocation10_spill]] }
 0xb66   : > { %p28_p7 = scmp.ge.s32.totalorder %s31_s25, 6   ;;  %s2756_s19 = sld [smem:[#allocation11_spill]] }
 0xb67   : > { %s2757_s20 = sld [smem:[#allocation20_spill]] }
 0xb68   : > { %s2758_s21 = sld [smem:[#allocation13_spill]]  ;;  %30 = sbr.rel (!%p28_p7) target bundleno = 19 (0x13), region = 169 }
 0xb69   : > { %s2759_s22 = sld [smem:[#allocation14_spill]] }
 0xb6a   : > { %s2760_s23 = sld [smem:[#allocation16_spill]] }
 0xb6b   : > { %s2761_s24 = sld [smem:[#allocation17_spill]] }
 0xb6d   :  { %1607 = vsyncpa [#allocation4], 1 }
 0xb6e   :  { %1609 = vsyncpa [#allocation4 + $0x1], 1 }
 0xb6f   :  { %1610 = vsyncpa [#allocation5], 1 }
 0xb70   :  { %1612 = vsyncpa [#allocation5 + $0x1], 1 }

</bundles_post_ra>
